<compile_context>
chip_gen: v5e
topology: v5e:2x2
jax: 0.10.0
libtpu: 0.0.40
codegen_flags: <defaults>
</compile_context>

<pallas_src>
import functools

import jax
import jax.numpy as jnp
from jax import lax
from jax.experimental import pallas as pl
from jax.experimental.pallas import tpu as pltpu

SELU_ALPHA = 1.6732632423543772
SELU_SCALE = 1.0507009873554805
BN_EPS = 1e-5


def _elu(x):
    return jnp.where(x > 0, x, jnp.exp(x) - 1.0)


def _selu(x):
    return SELU_SCALE * jnp.where(x > 0, x, SELU_ALPHA * (jnp.exp(x) - 1.0))


def _round_up(x, m):
    return ((x + m - 1) // m) * m


@functools.lru_cache(maxsize=None)
def _device_kind() -> str:
    try:
        return jax.devices()[0].device_kind.lower()
    except Exception:
        return ""


def _vmem_limit_bytes() -> int:
    k = _device_kind()
    if ("v5" in k) or ("v6" in k):
        return 96 * 1024 * 1024          # 128 MiB physical VMEM on v5e / v6e
    return 48 * 1024 * 1024              # v7x (64 MiB physical) and unknown chips


def _bf16_act_ok() -> bool:
    # bf16 EUP/VPU path exists on v6e / v7x; keep elementwise math f32 on v5e.
    k = _device_kind()
    return ("v6" in k) or ("v7" in k)


def _choose_gnn_tiles(n_dst, n_src, eh, ehid, vmem_limit):
    """Pick (dst_tile, src_tile) so pairwise temps (z f32 + h bf16 + msg f32) stay
    within ~half the VMEM budget; prefer a single unpadded dst tile (fused BN)."""
    per_pair = 6 * eh + 4 * ehid                       # bytes of live temps per pair
    max_pairs = max((vmem_limit // 2) // per_pair, 8 * 128)
    ns = _round_up(n_src, 16)                          # bf16 sublane packing = 16

    if n_dst * min(ns, 128) <= max_pairs:
        td = n_dst                                     # single dst tile (BN stays fused)
    else:
        td = 128
        while td * 2 <= 256 and (td * 2) * 128 <= max_pairs:
            td *= 2

    if td * ns <= max_pairs:
        ts = ns                                        # single (padded) src tile
    else:
        ts = 128
        while td * (ts * 2) <= max_pairs and ts < 2048:
            ts *= 2
    return td, ts


# ----------------------------- Pallas kernels ------------------------------


def mlp_kernel(x_ref, w1_ref, b1_ref, w2_ref, b2_ref, o_ref, *, final_act):
    """CustomMLP: Linear -> ELU -> Linear -> (ELU). bf16 MXU inputs, f32 accumulation."""
    z = jnp.dot(x_ref[...], w1_ref[...], preferred_element_type=jnp.float32) + b1_ref[...]
    h = _elu(z).astype(jnp.bfloat16)
    y = jnp.dot(h, w2_ref[...], preferred_element_type=jnp.float32) + b2_ref[...]
    if final_act:
        y = _elu(y)
    o_ref[...] = y


def mlp_logsoftmax_kernel(x_ref, w1_ref, b1_ref, w2_ref, b2_ref, o_ref):
    """Fused backbone proj_out (final_act=False) + log_softmax.  Output is lane-padded
    to 128 columns (padded columns carry -1e30 bias -> exp underflows to 0)."""
    z = jnp.dot(x_ref[...], w1_ref[...], preferred_element_type=jnp.float32) + b1_ref[...]
    h = _elu(z).astype(jnp.bfloat16)
    y = jnp.dot(h, w2_ref[...], preferred_element_type=jnp.float32) + b2_ref[...]
    m = jnp.max(y, axis=-1, keepdims=True)
    s = y - m
    lse = jnp.log(jnp.sum(jnp.exp(s), axis=-1, keepdims=True))
    o_ref[...] = s - lse


def bn_selu_kernel(x_ref, o_ref):
    """Standalone CustomBatchNorm1d (batch stats) + SELU over the full dst batch."""
    x = x_ref[...]
    mean = jnp.mean(x, axis=0, keepdims=True)
    var = jnp.mean((x - mean) ** 2, axis=0, keepdims=True)
    o_ref[...] = _selu((x - mean) * lax.rsqrt(var + BN_EPS))


def gnn_layer_kernel(flags_ref, hs_ref, hd_ref, adj_ref, w1s_ref, w1d_ref, b1_ref,
                     w2bd_ref, b2_ref, wo_ref, bo_ref, o_ref, zd_scr, agg_scr,
                     *, n_etypes, hidden, fuse_bn, bf16_act):
    """One fused GNN_layer forward for a (dst-tile, src-tile) grid point:

        per-etype edge MLP over (dst, src) pairs      (dense block adjacency)
        -> copy_e + fn.sum over incident edges        (adjacency-masked sum over src)
        -> sum over etypes ('stack' reducer + sum)    (per-etype masked reduces)
        -> proj_out(agg) + identity skip
        -> [BatchNorm + SELU fused when the dst batch fits one unpadded tile]

    Grid = (dst tiles ["parallel"], src tiles ["arbitrary" reduction]).  The edge-MLP
    first layer on cat([h_src, h_dst]) is factorized into h_src@W1_src + h_dst@W1_dst
    with per-etype halves lane-packed (one wide MXU pass, b1 folded into the dst
    projection).  The second layer uses a block-diagonal W2 (eh -> E*hidden) so all
    etypes share one 128-wide MXU pass.  Empty adjacency stripes are skipped via the
    scalar-prefetched flags (block sparsity)."""
    d = pl.program_id(0)
    s = pl.program_id(1)

    td = hd_ref.shape[0]
    ts = hs_ref.shape[0]
    eh = w1s_ref.shape[1]
    ehid = b2_ref.shape[1]

    @pl.when(s == 0)
    def _init():
        # dst-side projection for all etypes (lane-packed) + folded b1; once per dst tile.
        zd_scr[...] = (
            jnp.dot(hd_ref[...].astype(jnp.bfloat16), w1d_ref[...],
                    preferred_element_type=jnp.float32)
            + b1_ref[...]
        )
        agg_scr[...] = jnp.zeros_like(agg_scr)

    @pl.when(flags_ref[d, s] > 0)                       # skip all-zero adjacency stripes
    def _compute():
        # src-side projection for this src tile, all etypes in one wide matmul.
        zs = jnp.dot(hs_ref[...], w1s_ref[...], preferred_element_type=jnp.float32)
        z = zd_scr[...][:, None, :] + zs[None, :, :]    # (td, ts, eh) pairwise
        if bf16_act:
            hpair = _elu(z.astype(jnp.bfloat16))        # bf16 EUP path (v6e/v7x)
        else:
            hpair = _elu(z).astype(jnp.bfloat16)        # f32 EUP on v5e
        # Second edge-MLP layer: one block-diagonal MXU pass over all etypes.
        # ts is a multiple of 16 (wrapper pads), so the reshape is a pure view.
        m = jnp.dot(hpair.reshape(td * ts, eh), w2bd_ref[...],
                    preferred_element_type=jnp.float32) + b2_ref[...]
        if bf16_act:
            msg = _elu(m.astype(jnp.bfloat16))
        else:
            msg = _elu(m)
        msg = msg.reshape(td, ts, ehid)
        agg = agg_scr[...]
        for e in range(n_etypes):                       # static unroll, E is small
            a = adj_ref[e].astype(jnp.float32)          # (td, ts) 0/1 mask
            agg = agg + jnp.sum(
                msg[:, :, e * hidden:(e + 1) * hidden] * a[:, :, None], axis=1)
        agg_scr[...] = agg

    @pl.when(s == pl.num_programs(1) - 1)
    def _finalize():
        out = (jnp.dot(agg_scr[...].astype(jnp.bfloat16), wo_ref[...],
                       preferred_element_type=jnp.float32)
               + bo_ref[...]
               + hd_ref[...])                           # proj_skip == Identity (in == out)
        if fuse_bn:                                     # full dst batch in this one tile
            mean = jnp.mean(out, axis=0, keepdims=True)
            var = jnp.mean((out - mean) ** 2, axis=0, keepdims=True)
            out = _selu((out - mean) * lax.rsqrt(var + BN_EPS))
        o_ref[...] = out


# ----------------------------- pallas_call wrappers -------------------------


def mlp_call(x, w1, b1, w2, b2, *, final_act=True, logsoftmax=False):
    n, fi = x.shape
    hid = w1.shape[1]
    fo = w2.shape[1]

    fo_p = fo
    if logsoftmax and fo < 128:
        # lane-dense output slab: pad logits to 128 columns with -inf-ish bias.
        fo_p = 128
        w2 = jnp.pad(w2, ((0, 0), (0, fo_p - fo)))
        b2 = jnp.pad(b2, ((0, 0), (0, fo_p - fo)), constant_values=-1e30)

    x = x.astype(jnp.bfloat16)                          # half-width HBM->VMEM DMA
    if n <= 256:
        tm, n_p = n, n                                  # single full-extent tile
    else:
        tm = 256
        n_p = _round_up(n, tm)
        if n_p != n:
            x = jnp.pad(x, ((0, n_p - n), (0, 0)))

    kernel = (mlp_logsoftmax_kernel if logsoftmax
              else functools.partial(mlp_kernel, final_act=final_act))
    out = pl.pallas_call(
        kernel,
        out_shape=jax.ShapeDtypeStruct((n_p, fo_p), jnp.float32),
        grid=(n_p // tm,),
        in_specs=[
            pl.BlockSpec((tm, fi), lambda i: (i, 0)),
            pl.BlockSpec((fi, hid), lambda i: (0, 0)),
            pl.BlockSpec((1, hid), lambda i: (0, 0)),
            pl.BlockSpec((hid, fo_p), lambda i: (0, 0)),
            pl.BlockSpec((1, fo_p), lambda i: (0, 0)),
        ],
        out_specs=pl.BlockSpec((tm, fo_p), lambda i: (i, 0)),
        compiler_params=pltpu.CompilerParams(
            dimension_semantics=("parallel",),          # node tiles shard across TCs (v7x)
            vmem_limit_bytes=_vmem_limit_bytes(),
        ),
    )(x, w1, b1, w2, b2)
    return out[:n, :fo]


def bn_selu_call(x):
    n, f = x.shape
    return pl.pallas_call(
        bn_selu_kernel,
        out_shape=jax.ShapeDtypeStruct((n, f), jnp.float32),
        grid=(1,),
        in_specs=[pl.BlockSpec((n, f), lambda i: (0, 0))],
        out_specs=pl.BlockSpec((n, f), lambda i: (0, 0)),
        compiler_params=pltpu.CompilerParams(vmem_limit_bytes=_vmem_limit_bytes()),
    )(x)


def gnn_layer_call(h, adj, lp):
    """Fused GNN_layer (+ BatchNorm1d + SELU, fused or decoupled) for one block."""
    n_etypes, n_dst, n_src = adj.shape
    feat = h.shape[1]
    hidden = lp["wo"].shape[0]
    eh = lp["w1s"].shape[1]
    ehid = lp["b2"].shape[1]
    vlim = _vmem_limit_bytes()
    bf16_act = _bf16_act_ok()

    td, ts = _choose_gnn_tiles(n_dst, n_src, eh, ehid, vlim)
    n_dst_p = _round_up(n_dst, td)
    n_src_p = _round_up(n_src, ts)
    grid_d, grid_s = n_dst_p // td, n_src_p // ts
    fuse_bn = (td == n_dst)                             # single, unpadded dst tile

    hs = h.astype(jnp.bfloat16)                         # src features feed the MXU only
    hd = h[:n_dst]                                      # f32: also the identity-skip addend
    if n_src_p != n_src:
        hs = jnp.pad(hs, ((0, n_src_p - n_src), (0, 0)))      # zero rows: cancelled by mask
    if n_dst_p != n_dst:
        hd = jnp.pad(hd, ((0, n_dst_p - n_dst), (0, 0)))
    adj_p = adj
    if (n_dst_p, n_src_p) != (n_dst, n_src):
        adj_p = jnp.pad(adj, ((0, 0), (0, n_dst_p - n_dst), (0, n_src_p - n_src)))

    # Per (dst-tile, src-tile) "stripe has any edge" flags -> SMEM scalar prefetch; lets
    # the kernel skip the pairwise edge MLP for empty stripes (block sparsity).
    flags = jnp.any(
        adj_p.reshape(n_etypes, grid_d, td, grid_s, ts) != 0, axis=(0, 2, 4)
    ).astype(jnp.int32)

    kernel = functools.partial(gnn_layer_kernel, n_etypes=n_etypes, hidden=hidden,
                               fuse_bn=fuse_bn, bf16_act=bf16_act)
    out = pl.pallas_call(
        kernel,
        out_shape=jax.ShapeDtypeStruct((n_dst_p, hidden), jnp.float32),
        grid_spec=pltpu.PrefetchScalarGridSpec(
            num_scalar_prefetch=1,
            grid=(grid_d, grid_s),
            in_specs=[
                pl.BlockSpec((ts, feat), lambda d, s, fl: (s, 0)),             # h_src tile (bf16)
                pl.BlockSpec((td, feat), lambda d, s, fl: (d, 0)),             # h_dst tile (f32)
                pl.BlockSpec((n_etypes, td, ts), lambda d, s, fl: (0, d, s)),  # adjacency stripe
                pl.BlockSpec((feat, eh), lambda d, s, fl: (0, 0)),             # W1 src halves
                pl.BlockSpec((feat, eh), lambda d, s, fl: (0, 0)),             # W1 dst halves
                pl.BlockSpec((1, eh), lambda d, s, fl: (0, 0)),                # b1 (lane-packed)
                pl.BlockSpec((eh, ehid), lambda d, s, fl: (0, 0)),             # W2 block-diagonal
                pl.BlockSpec((1, ehid), lambda d, s, fl: (0, 0)),              # b2 (lane-packed)
                pl.BlockSpec((hidden, hidden), lambda d, s, fl: (0, 0)),       # proj_out W
                pl.BlockSpec((1, hidden), lambda d, s, fl: (0, 0)),            # proj_out b
            ],
            out_specs=pl.BlockSpec((td, hidden), lambda d, s, fl: (d, 0)),     # written once / tile
            scratch_shapes=[
                pltpu.VMEM((td, eh), jnp.float32),      # zd (dst projection, b1 folded in)
                pltpu.VMEM((td, hidden), jnp.float32),  # message accumulator
            ],
        ),
        compiler_params=pltpu.CompilerParams(
            dimension_semantics=("parallel", "arbitrary"),   # dst tiles shard TCs, src reduces
            vmem_limit_bytes=vlim,
        ),
    )(flags, hs, hd, adj_p, lp["w1s"], lp["w1d"], lp["b1"], lp["w2bd"], lp["b2"],
      lp["wo"], lp["bo"])

    out = out[:n_dst]
    if not fuse_bn:
        out = bn_selu_call(out)                         # decoupled full-batch BN + SELU
    return out


# ----------------------------- parameter init -------------------------------


def init_linear(key, fan_in, fan_out):
    kw, kb = jax.random.split(key)
    scale = 1.0 / jnp.sqrt(jnp.float32(fan_in))
    w = jax.random.uniform(kw, (fan_in, fan_out), jnp.float32, -scale, scale)
    b = jax.random.uniform(kb, (1, fan_out), jnp.float32, -scale, scale)
    return w, b


def init_params(key, in_feats, hidden, out_feats, num_layers, n_etypes,
                mlp12_dim, mlp3_dim):
    keys = jax.random.split(key, num_layers + 2)
    params = {}

    # proj_in: CustomMLP(in_feats -> mlp12_dim -> hidden), final_act=True
    k1, k2 = jax.random.split(keys[0])
    w1, b1 = init_linear(k1, in_feats, mlp12_dim)
    w2, b2 = init_linear(k2, mlp12_dim, hidden)
    params["proj_in"] = (w1.astype(jnp.bfloat16), b1, w2.astype(jnp.bfloat16), b2)

    layers = []
    for i in range(num_layers):
        lk = jax.random.split(keys[1 + i], 2 * n_etypes + 1)
        w1s_l, w1d_l, b1_l, b2_l = [], [], [], []
        w2bd = jnp.zeros((n_etypes * mlp3_dim, n_etypes * hidden), jnp.float32)
        for e in range(n_etypes):
            # edge MLP: CustomMLP(2*hidden -> mlp3_dim -> hidden), final_act=True
            we1, be1 = init_linear(lk[2 * e], 2 * hidden, mlp3_dim)
            we2, be2 = init_linear(lk[2 * e + 1], mlp3_dim, hidden)
            w1s_l.append(we1[:hidden])      # src half of the concat
            w1d_l.append(we1[hidden:])      # dst half of the concat
            b1_l.append(be1)
            b2_l.append(be2)
            w2bd = w2bd.at[e * mlp3_dim:(e + 1) * mlp3_dim,
                           e * hidden:(e + 1) * hidden].set(we2)
        wo, bo = init_linear(lk[-1], hidden, hidden)    # GNN_layer.proj_out
        layers.append({
            # per-etype first-layer weights packed along the lane axis -> one wide MXU pass
            "w1s": jnp.concatenate(w1s_l, axis=1).astype(jnp.bfloat16),   # (hidden, E*mlp3)
            "w1d": jnp.concatenate(w1d_l, axis=1).astype(jnp.bfloat16),   # (hidden, E*mlp3)
            "b1": jnp.concatenate(b1_l, axis=1),                          # (1, E*mlp3) f32
            # block-diagonal second layer: one lane-packed MXU pass over all etypes
            "w2bd": w2bd.astype(jnp.bfloat16),                            # (E*mlp3, E*hidden)
            "b2": jnp.concatenate(b2_l, axis=1),                          # (1, E*hidden) f32
            "wo": wo.astype(jnp.bfloat16),
            "bo": bo,
        })
    params["layers"] = layers

    # backbone proj_out: CustomMLP(hidden*(L+1) -> mlp12_dim -> out_feats), final_act=False
    k1, k2 = jax.random.split(keys[-1])
    w1, b1 = init_linear(k1, hidden * (num_layers + 1), mlp12_dim)
    w2, b2 = init_linear(k2, mlp12_dim, out_feats)
    params["proj_out"] = (w1.astype(jnp.bfloat16), b1, w2.astype(jnp.bfloat16), b2)
    return params


# ----------------------------- forward pass ---------------------------------


def gnn_backbone_forward(feature, adjs, params, final_num):
    """Mirrors GNN_backbone.forward (bn_type=0, dropouts = identity)."""
    # dropout_in -> identity; proj_in MLP
    h = mlp_call(feature, *params["proj_in"], final_act=True)
    inter = [h[:final_num]]
    for adj, lp in zip(adjs, params["layers"]):
        # fused: edge messages + masked sum + etype sum + proj_out + skip (+ BN + SELU)
        h = gnn_layer_call(h, adj, lp)
        inter.append(h[:final_num])
    # torch.stack(dim=1).reshape(N, -1) == concat along the feature axis
    hcat = jnp.concatenate(inter, axis=-1)
    # fused proj_out MLP + log_softmax (lane-padded output, sliced in the wrapper)
    return mlp_call(hcat, *params["proj_out"], final_act=False, logsoftmax=True)


# ----------------------------- main ------------------------------------------

if __name__ == "__main__":
    in_feats, hidden, out_feats = 12, 64, 8
    num_layers = 2
    n_etypes = 2
    mlp12_dim, mlp3_dim = 64, 64
    node_counts = [32, 16, 8]        # N_src per block; block i: N_i -> N_{i+1}
    final_num = node_counts[-1]

    key = jax.random.PRNGKey(0)
    k_feat, k_adj, k_param = jax.random.split(key, 3)

    feature = jax.random.normal(k_feat, (node_counts[0], in_feats), jnp.float32)

    adjs = []
    akeys = jax.random.split(k_adj, num_layers)
    for i in range(num_layers):
        n_src, n_dst = node_counts[i], node_counts[i + 1]
        adj = jax.random.bernoulli(akeys[i], 0.3, (n_etypes, n_dst, n_src))
        adjs.append(adj.astype(jnp.bfloat16))     # bf16 adjacency halves DMA bytes

    params = init_params(k_param, in_feats, hidden, out_feats, num_layers,
                         n_etypes, mlp12_dim, mlp3_dim)

    out = gnn_backbone_forward(feature, adjs, params, final_num)
    out = jax.block_until_ready(out)
    assert out.shape == (final_num, out_feats)
    assert bool(jnp.all(jnp.isfinite(out)))
    print("KERNEL_OK")
</pallas_src>

<mosaic_0001>
module attributes {stable_mosaic.version = 11 : i64} {
  func.func @mlp_kernel(%arg0: i32, %arg1: memref<32x12xbf16, #tpu.memory_space<vmem>>, %arg2: memref<12x64xbf16, #tpu.memory_space<vmem>>, %arg3: memref<1x64xf32, #tpu.memory_space<vmem>>, %arg4: memref<64x64xbf16, #tpu.memory_space<vmem>>, %arg5: memref<1x64xf32, #tpu.memory_space<vmem>>, %arg6: memref<32x64xf32, #tpu.memory_space<vmem>>) attributes {dimension_semantics = [#tpu.dimension_semantics<parallel>], iteration_bounds = array<i64: 1>, scalar_prefetch = 0 : i64, scratch_operands = 0 : i64, tpu.core_type = #tpu.core_type<tc>, window_params = [{transform_indices = @transform_0, window_bounds = array<i64: 32, 12>}, {pipeline_mode = #tpu.pipeline_mode<synchronous>, transform_indices = @transform_1, window_bounds = array<i64: 12, 64>}, {pipeline_mode = #tpu.pipeline_mode<synchronous>, transform_indices = @transform_2, window_bounds = array<i64: 1, 64>}, {pipeline_mode = #tpu.pipeline_mode<synchronous>, transform_indices = @transform_3, window_bounds = array<i64: 64, 64>}, {pipeline_mode = #tpu.pipeline_mode<synchronous>, transform_indices = @transform_4, window_bounds = array<i64: 1, 64>}, {transform_indices = @transform_5, window_bounds = array<i64: 32, 64>}]} {
    %c0 = arith.constant 0 : index
    %c0_0 = arith.constant 0 : index
    %0 = vector.load %arg1[%c0, %c0_0] : memref<32x12xbf16, #tpu.memory_space<vmem>>, vector<32x12xbf16>
    %c0_1 = arith.constant 0 : index
    %c0_2 = arith.constant 0 : index
    %1 = vector.load %arg2[%c0_1, %c0_2] : memref<12x64xbf16, #tpu.memory_space<vmem>>, vector<12x64xbf16>
    %cst = arith.constant dense<0.000000e+00> : vector<32x64xf32>
    %2 = tpu.matmul %0, %1, %cst {dimension_numbers = #tpu.dot_dimension_numbers<[1], [0], [0], [1], [0, 0, 1, 1], [], []>} : vector<32x12xbf16>, vector<12x64xbf16>, vector<32x64xf32> -> vector<32x64xf32>
    %c0_3 = arith.constant 0 : index
    %c0_4 = arith.constant 0 : index
    %3 = vector.load %arg3[%c0_3, %c0_4] : memref<1x64xf32, #tpu.memory_space<vmem>>, vector<1x64xf32>
    %4 = vector.broadcast %3 : vector<1x64xf32> to vector<32x64xf32>
    %5 = arith.addf %2, %4 : vector<32x64xf32>
    %cst_5 = arith.constant 0.000000e+00 : f32
    %6 = vector.broadcast %cst_5 : f32 to vector<32x64xf32>
    %7 = arith.cmpf ogt, %5, %6 : vector<32x64xf32>
    %8 = math.exp %5 : vector<32x64xf32>
    %cst_6 = arith.constant 1.000000e+00 : f32
    %9 = vector.broadcast %cst_6 : f32 to vector<32x64xf32>
    %10 = arith.subf %8, %9 : vector<32x64xf32>
    %11 = arith.select %7, %5, %10 : vector<32x64xi1>, vector<32x64xf32>
    %12 = arith.truncf %11 : vector<32x64xf32> to vector<32x64xbf16>
    %c0_7 = arith.constant 0 : index
    %c0_8 = arith.constant 0 : index
    %13 = vector.load %arg4[%c0_7, %c0_8] : memref<64x64xbf16, #tpu.memory_space<vmem>>, vector<64x64xbf16>
    %cst_9 = arith.constant dense<0.000000e+00> : vector<32x64xf32>
    %14 = tpu.matmul %12, %13, %cst_9 {dimension_numbers = #tpu.dot_dimension_numbers<[1], [0], [0], [1], [0, 0, 1, 1], [], []>} : vector<32x64xbf16>, vector<64x64xbf16>, vector<32x64xf32> -> vector<32x64xf32>
    %c0_10 = arith.constant 0 : index
    %c0_11 = arith.constant 0 : index
    %15 = vector.load %arg5[%c0_10, %c0_11] : memref<1x64xf32, #tpu.memory_space<vmem>>, vector<1x64xf32>
    %16 = vector.broadcast %15 : vector<1x64xf32> to vector<32x64xf32>
    %17 = arith.addf %14, %16 : vector<32x64xf32>
    %cst_12 = arith.constant 0.000000e+00 : f32
    %18 = vector.broadcast %cst_12 : f32 to vector<32x64xf32>
    %19 = arith.cmpf ogt, %17, %18 : vector<32x64xf32>
    %20 = math.exp %17 : vector<32x64xf32>
    %cst_13 = arith.constant 1.000000e+00 : f32
    %21 = vector.broadcast %cst_13 : f32 to vector<32x64xf32>
    %22 = arith.subf %20, %21 : vector<32x64xf32>
    %23 = arith.select %19, %17, %22 : vector<32x64xi1>, vector<32x64xf32>
    %c0_14 = arith.constant 0 : index
    %c0_15 = arith.constant 0 : index
    %24 = vector.load %arg6[%c0_14, %c0_15] : memref<32x64xf32, #tpu.memory_space<vmem>>, vector<32x64xf32>
    tpu.vector_store %arg6[%c0_14, %c0_15], %23 {strides = array<i32>} : memref<32x64xf32, #tpu.memory_space<vmem>>, vector<32x64xf32>,
    return
  }
  func.func @transform_0(%arg0: i32) -> (i32, i32) {
    %c0_i32 = arith.constant 0 : i32
    %c0_i32_0 = arith.constant 0 : i32
    return %arg0, %c0_i32 : i32, i32
  }
  func.func @transform_1(%arg0: i32) -> (i32, i32) {
    %c0_i32 = arith.constant 0 : i32
    %c0_i32_0 = arith.constant 0 : i32
    %c0_i32_1 = arith.constant 0 : i32
    return %c0_i32, %c0_i32_0 : i32, i32
  }
  func.func @transform_2(%arg0: i32) -> (i32, i32) {
    %c0_i32 = arith.constant 0 : i32
    %c0_i32_0 = arith.constant 0 : i32
    %c0_i32_1 = arith.constant 0 : i32
    return %c0_i32, %c0_i32_0 : i32, i32
  }
  func.func @transform_3(%arg0: i32) -> (i32, i32) {
    %c0_i32 = arith.constant 0 : i32
    %c0_i32_0 = arith.constant 0 : i32
    %c0_i32_1 = arith.constant 0 : i32
    return %c0_i32, %c0_i32_0 : i32, i32
  }
  func.func @transform_4(%arg0: i32) -> (i32, i32) {
    %c0_i32 = arith.constant 0 : i32
    %c0_i32_0 = arith.constant 0 : i32
    %c0_i32_1 = arith.constant 0 : i32
    return %c0_i32, %c0_i32_0 : i32, i32
  }
  func.func @transform_5(%arg0: i32) -> (i32, i32) {
    %c0_i32 = arith.constant 0 : i32
    %c0_i32_0 = arith.constant 0 : i32
    return %arg0, %c0_i32 : i32, i32
  }
}

</mosaic_0001>

<bundles_post_ra>
// kernel: tpu_custom_call.1
= control target key start
LH: loop header
LB: loop body
LE: loop exit
PB: predicated region body
PF: predicated region fallthrough
CT: control target
= control target key end

     0   :  { %10 = vsyncpa [#allocation3], 0  ;;  %s414_s0 = inlined_call_operand.vmem [shape: bf16[32,12], index: 0, kind: input, shape index: {}]   ;;  %s415_s1 = inlined_call_operand.vmem [shape: bf16[12,64], index: 1, kind: input, shape index: {}]   ;;  %s416_s2 = inlined_call_operand.vmem [shape: f32[1,64], index: 2, kind: input, shape index: {}]   ;;  %s417_s3 = inlined_call_operand.hbm [shape: bf16[64,64], index: 3, kind: input, shape index: {}]   ;;  %s418_s4 = inlined_call_operand.vmem [shape: f32[1,64], index: 4, kind: input, shape index: {}]   ;;  %s419_s5 = inlined_call_operand.hbm [shape: f32[32,64], index: 5, kind: output, shape index: {}]  }
   0x1   :  { %11 = vsyncpa [#allocation4], 0  ;;  %s22_s20 = sshll.u32 %s417_s3, 4  ;;  %s348_s21 = smov [#allocation2]   ;;  %s23_s20 = int_to_ptr.hbm [resolvable:$true] %s22_s20 }
   0x2   :  { %s24_s22 = sshll.u32 %s348_s21, 4  ;;  %s349_s23 = smov 64   ;;  %s25_s22 = int_to_ptr.vmem [resolvable:$true] %s24_s22 }
   0x3   :  { %s350_s24 = smov 4  }
   0x4   :  { %30 = dma.hbm_to_vmem [thread:$0]  %s23_s20, 512, %s25_s22, [#allocation3], %s349_s23, %s349_s23, %s350_s24  }
   0x5   :  { %344 = dma.done.wait [#allocation3], 512  }
   0x6   :  { %345 = vsyncadd [#allocation3], 4294966784  ;;  %v230_v0 = vld [vmem:[%s415_s1] sm:$0xf]  ;;  %v262_v1 = vld [vmem:[%s415_s1] sm:$0x30] }
   0x7   :  { %vm70_vm0 = vcmask 1045504   ;;  %v231_v2 = vor.u32 %v262_v1, %v230_v0  ;;  %v260_v4 = vld [vmem:[%s414_s0] sm:$0xff]  ;;  %v261_v5 = vld [vmem:[%s414_s0 + $0x8] sm:$0xff]  ;;  %vm63_vm1 = vcmask 97280   ;;  %v266_v6 = vld [vmem:[#allocation2 + $0x18] sm:$0xff]  ;;  %vm151_vm4 = vcmask 523264  }
   0x8   :  { %162 = vmatpush.bf16.msra.mxu1 %v266_v6  ;;  %268 = vmatpush.bf16.msra.mxu2 %v266_v6  ;;  %v265_v7 = vld [vmem:[#allocation2 + $0x10] sm:$0xff]  ;;  %v264_v8 = vld [vmem:[#allocation2 + $0x8] sm:$0xff]  ;;  %v263_v9 = vld [vmem:[#allocation2] sm:$0xff]  ;;  %s207_s11 = sshll.u32 %s419_s5, 4  ;;  %s352_s12 = smov 128   ;;  %s208_s11 = int_to_ptr.hbm [resolvable:$true] %s207_s11 }
   0x9   :  { %v72_v3 = vsel %vm70_vm0, %v231_v2, 0  ;;  %v278_v10 = vld [vmem:[%s416_s2] ss:$0 sm:$0xff]  ;;  %s353_s13 = smov 8  }
   0xa   :  { %81 = vmatpush.bf16.msra.mxu0 %v72_v3  ;;  %267 = vmatpush.bf16.msra.mxu3 %v72_v3  ;;  %v279_v37 = vld [vmem:[%s418_s4] ss:$0 sm:$0xff]  ;;  %s351_s4 = smov [#allocation5]  }
   0xb   :  { %s205_s8 = sshll.u32 %s351_s4, 4  ;;  %s206_s8 = int_to_ptr.vmem [resolvable:$true] %s205_s8 }
   0xc   :  { %163 = vmatpush.bf16.msra.mxu1 %v265_v7  ;;  %269 = vmatpush.bf16.msra.mxu2 %v265_v7 }
   0xd   :  { %232 = vmatmul.msk.bf16.vlgmr.msra.gmra.mxu0 %vm63_vm1, %v260_v4  ;;  %233 = vmatmul.msk.bf16.vlgmr.msra.gmra.mxu3 %vm63_vm1, %v261_v5 }
  0x10   :  { %164 = vmatpush.bf16.msra.mxu1 %v264_v8  ;;  %270 = vmatpush.bf16.msra.mxu2 %v264_v8 }
  0x14   :  { %165 = vmatpush.bf16.msra.mxu1 %v263_v9  ;;  %271 = vmatpush.bf16.msra.mxu2 %v263_v9 }
  0x8a   :  { %v83_v11 = vpop.f32.mrf.mxu0 }
  0x8b   :  { %v84_v12 = vadd.f32 %v278_v10, %v83_v11 }
  0x8d   :  { %v97_v13 = vmul.f32 1.442695, %v84_v12  ;;  %vm93_vm2 = vcmp.gt.f32.partialorder %v84_v12, 0.0 }
  0x8f   :  { %280 = vpow2.f32 %v97_v13 }
  0x90   :  { %v88_v14 = vpop.f32.mrf.mxu3 }
  0x91   :  { %v89_v15 = vadd.f32 %v278_v10, %v88_v14 }
  0x92   :  { %v85_v16 = vpop.f32.mrf.mxu0 }
  0x93   :  { %v86_v17 = vadd.f32 %v278_v10, %v85_v16  ;;  %v101_v18 = vmul.f32 1.442695, %v89_v15  ;;  %vm95_vm5 = vcmp.gt.f32.partialorder %v89_v15, 0.0 }
  0x95   :  { %v99_v19 = vmul.f32 1.442695, %v86_v17  ;;  %v281_v21 = vpop.eup %280  ;;  %vm94_vm3 = vcmp.gt.f32.partialorder %v86_v17, 0.0 }
  0x96   :  { %v234_v24 = vadd.f32 -1.0, %v281_v21 }
  0x97   :  { %282 = vpow2.f32 %v99_v19 }
  0x98   :  { %v90_v20 = vpop.f32.mrf.mxu3  ;;  %284 = vpow2.f32 %v101_v18  ;;  %v109_v28 = vsel %vm93_vm2, %v84_v12, %v234_v24 }
  0x99   :  { %v91_v22 = vadd.f32 %v278_v10, %v90_v20 }
  0x9b   :  { %v103_v23 = vmul.f32 1.442695, %v91_v22  ;;  %vm96_vm6 = vcmp.gt.f32.partialorder %v91_v22, 0.0 }
  0x9d   :  { %v283_v25 = vpop.eup %282  ;;  %286 = vpow2.f32 %v103_v23 }
  0x9e   :  { %v235_v26 = vadd.f32 -1.0, %v283_v25  ;;  %v285_v27 = vpop.eup %284 }
  0x9f   :  { %v236_v31 = vadd.f32 -1.0, %v285_v27 }
  0xa0   :  { %v110_v29 = vsel %vm94_vm3, %v86_v17, %v235_v26 }
  0xa1   :  { %v113_v30 = vpack.c.bf16 %v110_v29, %v109_v28  ;;  %v111_v34 = vsel %vm95_vm5, %v89_v15, %v236_v31 }
  0xa3   :  { %v287_v32 = vpop.eup %286  ;;  %254 = vmatmul.msk.bf16.vlgmr.msra.gmra.mxu1 %vm151_vm4, %v113_v30 }
  0xa4   :  { %v237_v33 = vadd.f32 -1.0, %v287_v32 }
  0xa6   :  { %v112_v35 = vsel %vm96_vm6, %v91_v22, %v237_v33 }
  0xa7   :  { %v114_v36 = vpack.c.bf16 %v112_v35, %v111_v34 }
  0xa9   :  { %255 = vmatmul.msk.bf16.vlgmr.msra.gmra.mxu2 %vm151_vm4, %v114_v36 }
 0x120   :  { %v167_v38 = vpop.f32.mrf.mxu1 }
 0x121   :  { %v168_v39 = vadd.f32 %v279_v37, %v167_v38 }
 0x123   :  { %v181_v40 = vmul.f32 1.442695, %v168_v39  ;;  %vm177_vm7 = vcmp.gt.f32.partialorder %v168_v39, 0.0 }
 0x125   :  { %288 = vpow2.f32 %v181_v40 }
 0x128   :  { %v169_v41 = vpop.f32.mrf.mxu1 }
 0x129   :  { %v170_v42 = vadd.f32 %v279_v37, %v169_v41 }
 0x12b   :  { %v289_v43 = vpop.eup %288  ;;  %v183_v44 = vmul.f32 1.442695, %v170_v42  ;;  %vm178_vm8 = vcmp.gt.f32.partialorder %v170_v42, 0.0 }
 0x12c   :  { %v256_v45 = vadd.f32 -1.0, %v289_v43  ;;  %v172_v46 = vpop.f32.mrf.mxu2 }
 0x12d   :  { %290 = vpow2.f32 %v183_v44  ;;  %v173_v47 = vadd.f32 %v279_v37, %v172_v46 }
 0x12e   :  { %v193_v48 = vsel %vm177_vm7, %v168_v39, %v256_v45 }
 0x12f   :  { %197 = vst.msk [vmem:[#allocation5] sm:$0xff] %vm151_vm4, %v193_v48  ;;  %v185_v49 = vmul.f32 1.442695, %v173_v47  ;;  %vm179_vm9 = vcmp.gt.f32.partialorder %v173_v47, 0.0 }
 0x131   :  { %292 = vpow2.f32 %v185_v49 }
 0x133   :  { %v291_v50 = vpop.eup %290 }
 0x134   :  { %v257_v51 = vadd.f32 -1.0, %v291_v50  ;;  %v174_v52 = vpop.f32.mrf.mxu2 }
 0x135   :  { %v175_v53 = vadd.f32 %v279_v37, %v174_v52 }
 0x136   :  { %v194_v54 = vsel %vm178_vm8, %v170_v42, %v257_v51 }
 0x137   :  { %v293_v55 = vpop.eup %292  ;;  %198 = vst.msk [vmem:[#allocation5 + $0x8] sm:$0xff] %vm151_vm4, %v194_v54  ;;  %v187_v56 = vmul.f32 1.442695, %v175_v53  ;;  %vm180_vm10 = vcmp.gt.f32.partialorder %v175_v53, 0.0 }
 0x138   :  { %v258_v57 = vadd.f32 -1.0, %v293_v55 }
 0x139   :  { %294 = vpow2.f32 %v187_v56 }
 0x13a   :  { %v195_v58 = vsel %vm179_vm9, %v173_v47, %v258_v57 }
 0x13b   :  { %199 = vst.msk [vmem:[#allocation5 + $0x10] sm:$0xff] %vm151_vm4, %v195_v58 }
 0x13f   :  { %v295_v59 = vpop.eup %294 }
 0x140   :  { %v259_v60 = vadd.f32 -1.0, %v295_v59 }
 0x142   :  { %v196_v61 = vsel %vm180_vm10, %v175_v53, %v259_v60 }
 0x143   :  { %200 = vst.msk [vmem:[#allocation5 + $0x18] sm:$0xff] %vm151_vm4, %v196_v61 }
 0x144   :  { %213 = dma.vmem_to_hbm [thread:$0]  %s206_s8, 512, %s208_s11, [#allocation4], %s352_s12, %s352_s12, %s353_s13  }
 0x145   :  { %346 = dma.done.wait [#allocation4], 512  }
 0x146   :  { %347 = vsyncadd [#allocation4], 4294966784 }
 0x147   :  { %218 = vsyncpa [#allocation3], 1 }
 0x148   :  { %219 = vsyncpa [#allocation4], 1 }

</bundles_post_ra>
